<compile_context>
chip_gen: v7x
topology: tpu7x:2x2x1
jax: 0.10.0
libtpu: 0.0.40
codegen_flags: <defaults>
</compile_context>

<pallas_src>
import jax
import jax.numpy as jnp
from jax.experimental import pallas as pl
from jax.experimental.pallas import tpu as pltpu


# --------------------------------------------------------------------------
# Tiling helpers
# --------------------------------------------------------------------------
def _vmem_limit_bytes():
    """Explicit scoped-VMEM limit, derived from the chip with a safe fallback."""
    cap = 64 * 1024 * 1024  # conservative fallback (v7x physical)
    try:
        cap = int(pltpu.get_tpu_info().vmem_capacity_bytes)
    except Exception:
        pass
    # Leave headroom for compiler-internal scratch; cap well under v5e/v6e 128MiB.
    return max(32 * 1024 * 1024, min(cap - 2 * 1024 * 1024, 100 * 1024 * 1024))


def _divisor_tile(n, cap):
    """Largest multiple-of-8 divisor of n that is <= cap, else n itself."""
    if n <= 8 or n % 8 != 0:
        return n
    t = min(cap, n)
    t -= t % 8
    while t >= 8:
        if n % t == 0:
            return t
        t -= 8
    return n


def _pick_tq(S, H, D, pos_bytes, v_bytes, out_bytes, budget):
    """Largest query tile TQ (divisor of S, multiple of 8) fitting the VMEM budget."""
    if S <= 8 or S % 8 != 0:
        return S
    fixed = 2 * S * D * v_bytes                      # double-buffered v block

    def need(tq):
        return (fixed
                + 2 * H * tq * S * pos_bytes         # double-buffered pos tile
                + 2 * tq * D * out_bytes             # double-buffered out tile
                + tq * D * 4                         # f32 accumulator scratch
                + 2 * tq * 128 * 4)                  # mask tile (lane-padded)

    cands = sorted({t for t in range(8, S + 1, 8) if S % t == 0}, reverse=True)
    for tq in cands:
        if need(tq) <= budget:
            return tq
    return 8


# --------------------------------------------------------------------------
# Stage 1: key-masked value projection   v = (x @ W^T + b) * mask
# --------------------------------------------------------------------------
def _proj_kernel(x_ref, m_ref, wt_ref, b_ref, v_ref):
    # x_ref: (TM, D)  m_ref: (TM, 1)  wt_ref: (D, D)  b_ref: (1, D)  v_ref: (TM, D)
    v = jnp.dot(x_ref[...], wt_ref[...], preferred_element_type=jnp.float32)
    v_ref[...] = ((v + b_ref[...]) * m_ref[...]).astype(v_ref.dtype)


# --------------------------------------------------------------------------
# Stage 2: per-head  pos_h @ v_h  with heads merged into a lane-dense slab
# --------------------------------------------------------------------------
def _make_attn_kernel(H, hd):
    def kernel(pos_ref, v_ref, mq_ref, o_ref, acc_ref):
        # pos_ref: (H, TQ, S)   pos tile (resident across the inner batch loop)
        # v_ref  : (S, D)       key-masked value projection for batch b
        # mq_ref : (TQ, 1)      query-row mask for this (q, b)
        # o_ref  : (TQ, D)      output tile
        # acc_ref: (TQ, D) f32  per-head results merged into lane slices
        for h in range(H):
            acc_ref[:, h * hd:(h + 1) * hd] = jnp.dot(
                pos_ref[h], v_ref[:, h * hd:(h + 1) * hd],
                preferred_element_type=jnp.float32)
        # query-side mask + single full-width (lane-dense) store
        o_ref[...] = (acc_ref[...] * mq_ref[...]).astype(o_ref.dtype)
    return kernel


# --------------------------------------------------------------------------
# Wrapper
# --------------------------------------------------------------------------
def pos_attention(x, mask, pos_att, w_v, b_v, n_heads, *,
                  compute_dtype=jnp.bfloat16):
    """x: (B,S,D) f32, mask: (B,S) {0,1}, pos_att: (1,H,S,S) f32,
    w_v: (D,D) (nn.Linear weight, out x in), b_v: (D,).

    compute_dtype=bf16 (default) runs both matmuls on the bf16 MXU path with
    f32 accumulation and streams pos_att/v as bf16; pass jnp.float32 for an
    exact match to the f32 reference."""
    B, S, D = x.shape
    assert D % n_heads == 0
    hd = D // n_heads
    assert pos_att.shape == (1, n_heads, S, S), \
        "pos_att must have leading dim 1 (broadcast over batch)"
    assert mask.shape == (B, S)

    out_dtype = x.dtype
    pos_bytes = jnp.dtype(compute_dtype).itemsize
    v_bytes = jnp.dtype(compute_dtype).itemsize
    out_bytes = jnp.dtype(out_dtype).itemsize

    vmem_limit = _vmem_limit_bytes()
    budget = int(vmem_limit * 0.75)
    TQ = _pick_tq(S, n_heads, D, pos_bytes, v_bytes, out_bytes, budget)
    assert S % TQ == 0
    n_q = S // TQ

    mask_f = mask.astype(jnp.float32)

    # ---- stage 1: v = (x @ W^T + b) * mask, stored once in compute_dtype ----
    x_flat = x.reshape(B * S, D).astype(compute_dtype)
    m_flat = mask_f.reshape(B * S, 1)
    w_t = jnp.transpose(w_v).astype(compute_dtype)
    b2 = b_v.reshape(1, D).astype(jnp.float32)

    TM = _divisor_tile(B * S, 512)
    cd_bytes = jnp.dtype(compute_dtype).itemsize
    proj_cost = pl.CostEstimate(
        flops=2 * B * S * D * D, transcendentals=0,
        bytes_accessed=(B * S * D * (cd_bytes + v_bytes)
                        + D * D * cd_bytes + D * 4 + B * S * 4))

    v_masked = pl.pallas_call(
        _proj_kernel,
        out_shape=jax.ShapeDtypeStruct((B * S, D), compute_dtype),
        grid=((B * S) // TM,),
        in_specs=[
            pl.BlockSpec((TM, D), lambda i: (i, 0)),
            pl.BlockSpec((TM, 1), lambda i: (i, 0)),
            pl.BlockSpec((D, D), lambda i: (0, 0)),   # weight: constant block index
            pl.BlockSpec((1, D), lambda i: (0, 0)),   # bias:   constant block index
        ],
        out_specs=pl.BlockSpec((TM, D), lambda i: (i, 0)),
        compiler_params=pltpu.CompilerParams(
            dimension_semantics=("parallel",),
            vmem_limit_bytes=vmem_limit),
        cost_estimate=proj_cost,
    )(x_flat, m_flat, w_t, b2).reshape(B, S, D)

    # ---- stage 2: per-head pos @ v, heads merged lane-dense -----------------
    pos3 = pos_att.reshape(n_heads, S, S).astype(compute_dtype)
    mask_col = mask_f.reshape(B, S, 1)

    attn_cost = pl.CostEstimate(
        flops=2 * B * S * S * D, transcendentals=0,
        bytes_accessed=(n_heads * S * S * pos_bytes   # pos streamed once total
                        + n_q * B * S * D * v_bytes   # v re-streamed per q tile
                        + B * S * D * out_bytes
                        + n_q * B * S * 4))

    kernel = _make_attn_kernel(n_heads, hd)
    out = pl.pallas_call(
        kernel,
        out_shape=jax.ShapeDtypeStruct((B, S, D), out_dtype),
        # q OUTER, b INNER: pos tile's block index is independent of b, so it
        # stays resident in VMEM across the inner batch loop (no B× re-read).
        grid=(n_q, B),
        in_specs=[
            pl.BlockSpec((n_heads, TQ, S), lambda q, b: (0, q, 0)),
            pl.BlockSpec((pl.Squeezed(), S, D), lambda q, b: (b, 0, 0)),
            pl.BlockSpec((pl.Squeezed(), TQ, 1), lambda q, b: (b, q, 0)),
        ],
        out_specs=pl.BlockSpec((pl.Squeezed(), TQ, D), lambda q, b: (b, q, 0)),
        scratch_shapes=[pltpu.VMEM((TQ, D), jnp.float32)],
        compiler_params=pltpu.CompilerParams(
            dimension_semantics=("parallel", "arbitrary"),
            vmem_limit_bytes=vmem_limit),
        cost_estimate=attn_cost,
    )(pos3, v_masked, mask_col)
    return out


# --------------------------------------------------------------------------
# Pure-JAX reference mirroring the PyTorch forward
# --------------------------------------------------------------------------
def pos_attention_ref(x, mask, pos_att, w_v, b_v, n_heads):
    B, S, D = x.shape
    hd = D // n_heads
    v = x @ w_v.T + b_v                                            # (B,S,D)
    v = v.reshape(B, S, n_heads, hd).transpose(0, 2, 1, 3)         # (B,H,S,hd)
    m2 = mask[:, :, None] * mask[:, None, :]                       # (B,S,S)
    scores = jnp.where(m2[:, None, :, :] > 0, pos_att, 0.0)        # (B,H,S,S)
    h = jnp.einsum('bhqk,bhkd->bhqd', scores, v)                   # (B,H,S,hd)
    return h.transpose(0, 2, 1, 3).reshape(B, S, D)


if __name__ == "__main__":
    B, S, D, H = 2, 16, 32, 4

    key = jax.random.PRNGKey(0)
    k_x, k_w, k_b, k_m, k_p = jax.random.split(key, 5)

    x = jax.random.normal(k_x, (B, S, D), dtype=jnp.float32)
    # nn.Linear(dim, dim) parameters, deterministic init
    w_v = jax.random.normal(k_w, (D, D), dtype=jnp.float32) * (1.0 / jnp.sqrt(D))
    b_v = jax.random.normal(k_b, (D,), dtype=jnp.float32) * 0.02
    # padding-style mask (B, S), values in {0, 1}
    mask = (jax.random.uniform(k_m, (B, S)) > 0.3).astype(jnp.float32)
    # positional attention tensor (1, H, S, S)
    pos_att = jax.random.normal(k_p, (1, H, S, S), dtype=jnp.float32)

    ref = pos_attention_ref(x, mask, pos_att, w_v, b_v, H)

    # Exact f32 path: tight tolerance vs the f32 reference.
    out_f32 = jax.block_until_ready(
        pos_attention(x, mask, pos_att, w_v, b_v, H, compute_dtype=jnp.float32))
    assert out_f32.shape == (B, S, D)
    assert jnp.allclose(out_f32, ref, atol=1e-4, rtol=1e-4), "f32 mismatch vs reference"

    # Default fast path: bf16 MXU + bf16 pos/v streaming (f32 accumulation);
    # looser tolerance accounts for bf16 rounding of the inputs.
    out_bf16 = jax.block_until_ready(
        pos_attention(x, mask, pos_att, w_v, b_v, H))
    assert out_bf16.shape == (B, S, D)
    assert jnp.allclose(out_bf16, ref, atol=1e-1, rtol=5e-2), "bf16 mismatch vs reference"

    print("KERNEL_OK")
</pallas_src>

<mosaic_0001>
module attributes {stable_mosaic.version = 11 : i64} {
  func.func @_proj_kernel(%arg0: i32, %arg1: memref<32x32xf32, #tpu.memory_space<vmem>>, %arg2: memref<32x1xf32, #tpu.memory_space<vmem>>, %arg3: memref<32x32xf32, #tpu.memory_space<vmem>>, %arg4: memref<1x32xf32, #tpu.memory_space<vmem>>, %arg5: memref<32x32xf32, #tpu.memory_space<vmem>>) attributes {dimension_semantics = [#tpu.dimension_semantics<parallel>], iteration_bounds = array<i64: 1>, scalar_prefetch = 0 : i64, scratch_operands = 0 : i64, tpu.core_type = #tpu.core_type<tc>, window_params = [{transform_indices = @transform_0, window_bounds = array<i64: 32, 32>}, {transform_indices = @transform_1, window_bounds = array<i64: 32, 1>}, {pipeline_mode = #tpu.pipeline_mode<synchronous>, transform_indices = @transform_2, window_bounds = array<i64: 32, 32>}, {pipeline_mode = #tpu.pipeline_mode<synchronous>, transform_indices = @transform_3, window_bounds = array<i64: 1, 32>}, {transform_indices = @transform_4, window_bounds = array<i64: 32, 32>}]} {
    %c0 = arith.constant 0 : index
    %c0_0 = arith.constant 0 : index
    %0 = vector.load %arg1[%c0, %c0_0] : memref<32x32xf32, #tpu.memory_space<vmem>>, vector<32x32xf32>
    %c0_1 = arith.constant 0 : index
    %c0_2 = arith.constant 0 : index
    %1 = vector.load %arg3[%c0_1, %c0_2] : memref<32x32xf32, #tpu.memory_space<vmem>>, vector<32x32xf32>
    %cst = arith.constant dense<0.000000e+00> : vector<32x32xf32>
    %2 = tpu.matmul %0, %1, %cst {dimension_numbers = #tpu.dot_dimension_numbers<[1], [0], [0], [1], [0, 0, 1, 1], [], []>} : vector<32x32xf32>, vector<32x32xf32>, vector<32x32xf32> -> vector<32x32xf32>
    %c0_3 = arith.constant 0 : index
    %c0_4 = arith.constant 0 : index
    %3 = vector.load %arg4[%c0_3, %c0_4] : memref<1x32xf32, #tpu.memory_space<vmem>>, vector<1x32xf32>
    %4 = vector.broadcast %3 : vector<1x32xf32> to vector<32x32xf32>
    %5 = arith.addf %2, %4 : vector<32x32xf32>
    %c0_5 = arith.constant 0 : index
    %c0_6 = arith.constant 0 : index
    %6 = vector.load %arg2[%c0_5, %c0_6] : memref<32x1xf32, #tpu.memory_space<vmem>>, vector<32x1xf32>
    %7 = vector.broadcast %6 : vector<32x1xf32> to vector<32x32xf32>
    %8 = arith.mulf %5, %7 : vector<32x32xf32>
    %c0_7 = arith.constant 0 : index
    %c0_8 = arith.constant 0 : index
    %9 = vector.load %arg5[%c0_7, %c0_8] : memref<32x32xf32, #tpu.memory_space<vmem>>, vector<32x32xf32>
    tpu.vector_store %arg5[%c0_7, %c0_8], %8 {strides = array<i32>} : memref<32x32xf32, #tpu.memory_space<vmem>>, vector<32x32xf32>,
    return
  }
  func.func @transform_0(%arg0: i32) -> (i32, i32) {
    %c0_i32 = arith.constant 0 : i32
    %c0_i32_0 = arith.constant 0 : i32
    return %arg0, %c0_i32 : i32, i32
  }
  func.func @transform_1(%arg0: i32) -> (i32, i32) {
    %c0_i32 = arith.constant 0 : i32
    %c0_i32_0 = arith.constant 0 : i32
    return %arg0, %c0_i32 : i32, i32
  }
  func.func @transform_2(%arg0: i32) -> (i32, i32) {
    %c0_i32 = arith.constant 0 : i32
    %c0_i32_0 = arith.constant 0 : i32
    %c0_i32_1 = arith.constant 0 : i32
    return %c0_i32, %c0_i32_0 : i32, i32
  }
  func.func @transform_3(%arg0: i32) -> (i32, i32) {
    %c0_i32 = arith.constant 0 : i32
    %c0_i32_0 = arith.constant 0 : i32
    %c0_i32_1 = arith.constant 0 : i32
    return %c0_i32, %c0_i32_0 : i32, i32
  }
  func.func @transform_4(%arg0: i32) -> (i32, i32) {
    %c0_i32 = arith.constant 0 : i32
    %c0_i32_0 = arith.constant 0 : i32
    return %arg0, %c0_i32 : i32, i32
  }
}

</mosaic_0001>

<bundles_post_ra>
// kernel: tpu_custom_call.1
= control target key start
LH: loop header
LB: loop body
LE: loop exit
PB: predicated region body
PF: predicated region fallthrough
CT: control target
= control target key end

     0   :  { %9 = vsyncpa [#allocation3], 0  ;;  %s383_s0 = inlined_call_operand.vmem [shape: f32[32,32], index: 0, kind: input, shape index: {}]   ;;  %s384_s1 = inlined_call_operand.vmem [shape: f32[32,1], index: 1, kind: input, shape index: {}]   ;;  %s385_s2 = inlined_call_operand.hbm [shape: f32[32,32], index: 2, kind: input, shape index: {}]   ;;  %s386_s3 = inlined_call_operand.vmem [shape: f32[1,32], index: 3, kind: input, shape index: {}]   ;;  %s387_s4 = inlined_call_operand.hbm [shape: f32[32,32], index: 4, kind: output, shape index: {}]  }
   0x1   :  { %10 = vsyncpa [#allocation4], 0  ;;  %s288_s15 = smov [#allocation2]   ;;  %s240_s19 = scalar_lea.hbm %s385_s2, 512 }
   0x2   :  { %s20_s16 = sshll.u32 %s288_s15, 4  ;;  %p241_p0 = scmp.ne.s32.totalorder %s385_s2, %s240_s19  ;;  %s21_s16 = int_to_ptr.vmem [resolvable:$true] %s20_s16 }
   0x3   :  { %p244_p1 = scmp.lt.u32.totalorder %s240_s19, %s385_s2 }
   0x5   :  { %p246_p2 = pnand %p244_p1, %p241_p0 }
   0x7   :  { %249 = shalt.err (!%p246_p2)
}
   0x8   :  { %s250_s24 = scalar_lea.vmem %s21_s16, 512  ;;  %p255_p4 = scmp.lt.s32.totalorder %s21_s16, %s21_s16 }
   0x9   :  { %p251_p3 = scmp.ne.s32.totalorder %s21_s16, %s250_s24  ;;  %p256_p5 = scmp.lt.s32.totalorder %s250_s24, %s250_s24 }
   0xb   :  { %p257_p6 = por %p256_p5, %p255_p4 }
   0xd   :  { %p258_p7 = pnand %p257_p6, %p251_p3 }
   0xf   :  { %261 = shalt.err (!%p258_p7)
}
  0x10   :  { %s289_s25 = smov 128   ;;  %s290_s26 = smov 8  }
  0x11   :  { %26 = dma.hbm_to_vmem [thread:$0]  %s385_s2, 512, %s21_s16, [#allocation3], %s289_s25, %s289_s25, %s290_s26  }
  0x12   :  { %284 = dma.done.wait [#allocation3], 512  }
  0x13   :  { %285 = vsyncadd [#allocation3], 4294966784  ;;  %v291_v0 = vmov 0   ;;  %vm47_vm0 = vcmask 261120   ;;  %v36_v1 = vld [vmem:[#allocation2] sm:$0xff]  ;;  %v37_v2 = vld [vmem:[#allocation2 + $0x8] sm:$0xff] }
  0x14   :  { %239 = vset.pattern.permute.xlu1 %v291_v0  ;;  %238 = vset.pattern.permute.xlu0 %v291_v0  ;;  %v38_v3 = vld [vmem:[#allocation2 + $0x10] sm:$0xff]  ;;  %v221_v4 = vpack.c.bf16 %v37_v2, %v36_v1  ;;  %v39_v5 = vld [vmem:[#allocation2 + $0x18] sm:$0xff]  ;;  %v32_v6 = vld [vmem:[%s383_s0] sm:$0xff]  ;;  %s292_s19 = smov [#allocation5]  }
  0x15   :  { %v34_v7 = vld [vmem:[%s383_s0 + $0x10] sm:$0xff]  ;;  %v225_v8 = vpack.c.bf16 %v39_v5, %v38_v3  ;;  %215 = vmatprep.mubr.msk.f32.mxu0 %vm47_vm0, %v32_v6  ;;  %v145_v10 = vld [vmem:[%s384_s1] sm:$0xff]  ;;  %v148_v11 = vld [vmem:[%s384_s1 + $0x18] sm:$0xff] }
  0x16   :  { %218 = vmatprep.mubr.msk.f32.mxu1 %vm47_vm0, %v34_v7  ;;  %222 = vmatprep.subr.bf16.mxu0 %v221_v4  ;;  %v147_v9 = vld [vmem:[%s384_s1 + $0x10] sm:$0xff]  ;;  %v146_v12 = vld [vmem:[%s384_s1 + $0x8] sm:$0xff]  ;;  %v35_v14 = vld [vmem:[%s383_s0 + $0x18] sm:$0xff] }
  0x17   :  { %229 = vmatprep.subr.bf16.mxu1 %v221_v4  ;;  %224 = vmatpush3.bf16.msra.mxu0 %v221_v4  ;;  %v33_v13 = vld [vmem:[%s383_s0 + $0x8] sm:$0xff]  ;;  %v194_v17 = vld [vmem:[%s386_s3] ss:$0 sm:$0xff]  ;;  %s182_s0 = sshll.u32 %s292_s19, 4  ;;  %s183_s0 = int_to_ptr.vmem [resolvable:$true] %s182_s0 }
  0x18   :  { %231 = vmatpush3.bf16.msra.mxu1 %v221_v4  ;;  %226 = vmatprep.subr.bf16.mxu0 %v225_v8  ;;  %s262_s3 = scalar_lea.vmem %s183_s0, 512  ;;  %p267_p9 = scmp.lt.s32.totalorder %s183_s0, %s183_s0 }
  0x19   :  { %230 = vmatprep.subr.bf16.mxu1 %v225_v8  ;;  %161 = vperm.xlu1 %239, %v147_v9   ;;  %p263_p8 = scmp.ne.s32.totalorder %s183_s0, %s262_s3  ;;  %p268_p10 = scmp.lt.s32.totalorder %s262_s3, %s262_s3 }
  0x1a   :  { %151 = vperm.xlu0 %238, %v145_v10  }
  0x1b   :  { %228 = vmatpush3.bf16.msra.mxu0 %v225_v8  ;;  %p269_p11 = por %p268_p10, %p267_p9 }
  0x1c   :  { %232 = vmatpush3.bf16.msra.mxu1 %v225_v8 }
  0x1d   :  { %166 = vperm.xlu1 %239, %v148_v11   ;;  %p270_p12 = pnand %p269_p11, %p263_p8 }
  0x1e   :  { %156 = vperm.xlu0 %238, %v146_v12   ;;  %216 = vmatmul.mubr.msk.f32.vlgmr.msra.gmra.mrb[0].mxu0 %vm47_vm0, %v33_v13 }
  0x1f   :  { %219 = vmatmul.mubr.msk.f32.vlgmr.msra.gmra.mrb[0].mxu1 %vm47_vm0, %v35_v14 }
  0x98   :  { %v162_v15 = vpop.permute.xlu1 %161 }
  0x99   :  { %v152_v16 = vpop.permute.xlu0 %151 }
  0x9c   :  { %v167_v24 = vpop.permute.xlu1 %166 }
  0x9d   :  { %v157_v25 = vpop.permute.xlu0 %156 }
  0xf1   :  { %v217_v18 = vpop.f32.mrb[0].mxu0 }
  0xf2   :  { %v220_v19 = vpop.f32.mrb[0].mxu1  ;;  %v132_v20 = vadd.f32 %v217_v18, %v194_v17  ;;  %v126_v22 = vpop.f32.mrb[1].mxu0 }
  0xf3   :  { %v142_v21 = vadd.f32 %v220_v19, %v194_v17  ;;  %v136_v23 = vpop.f32.mrb[1].mxu1  ;;  %v127_v26 = vadd.f32 %v194_v17, %v126_v22 }
  0xf4   :  { %v137_v27 = vadd.f32 %v194_v17, %v136_v23  ;;  %v170_v28 = vmul.f32 %v157_v25, %v132_v20 }
  0xf5   :  { %v172_v29 = vmul.f32 %v167_v24, %v142_v21  ;;  %v169_v30 = vmul.f32 %v152_v16, %v127_v26 }
  0xf6   :  { %v171_v31 = vmul.f32 %v162_v15, %v137_v27  ;;  %174 = vst.msk [vmem:[#allocation5 + $0x8] sm:$0xff] %vm47_vm0, %v170_v28 }
  0xf7   :  { %176 = vst.msk [vmem:[#allocation5 + $0x18] sm:$0xff] %vm47_vm0, %v172_v29  ;;  %173 = vst.msk [vmem:[#allocation5] sm:$0xff] %vm47_vm0, %v169_v30 }
  0xf8   :  { %175 = vst.msk [vmem:[#allocation5 + $0x10] sm:$0xff] %vm47_vm0, %v171_v31 }
  0xf9   :  { %273 = shalt.err (!%p270_p12)
}
  0xfa   :  { %s274_s22 = scalar_lea.hbm %s387_s4, 512 }
  0xfb   :  { %p275_p13 = scmp.ne.s32.totalorder %s387_s4, %s274_s22  ;;  %p278_p0 = scmp.lt.u32.totalorder %s274_s22, %s387_s4 }
  0xfd   :  { %p280_p1 = pnand %p278_p0, %p275_p13 }
  0xff   :  { %283 = shalt.err (!%p280_p1)
}
 0x100   :  { %188 = dma.vmem_to_hbm [thread:$0]  %s183_s0, 512, %s387_s4, [#allocation4], %s289_s25, %s289_s25, %s290_s26  }
 0x101   :  { %286 = dma.done.wait [#allocation4], 512  }
 0x102   :  { %287 = vsyncadd [#allocation4], 4294966784 }
 0x103   :  { %192 = vsyncpa [#allocation3], 1 }
 0x104   :  { %193 = vsyncpa [#allocation4], 1 }

</bundles_post_ra>
